<compile_context>
chip_gen: v7x
topology: tpu7x:2x2x1
jax: 0.10.0
libtpu: 0.0.40
codegen_flags: <defaults>
</compile_context>

<pallas_src>
import functools

import jax
import jax.numpy as jnp
from jax.experimental import pallas as pl
from jax.experimental.pallas import tpu as pltpu


# ---------------------------------------------------------------------------
# Kernels
# ---------------------------------------------------------------------------

def _gat_proj_kernel(x_ref, w_ref, wh_ref, f2_ref, *, wh_cols):
    """Head-fused projection: x @ [W_all | W@a2] -> (Wh_all, f2_all).

    One wide MXU matmul per row tile produces every head's Wh (stored bf16)
    plus the per-head f2 = Wh @ a2 column (f32), instead of H narrow matmuls.
    """
    x = x_ref[...].astype(jnp.bfloat16)                     # bf16 MXU inputs
    proj = jnp.dot(x, w_ref[...], preferred_element_type=jnp.float32)
    wh_ref[...] = proj[:, :wh_cols].astype(jnp.bfloat16)    # (TN, H*F_out) bf16
    f2_ref[...] = proj[:, wh_cols:]                         # (TN, H)       f32


def _gat_attn_kernel(wh_ref, f2_ref, a_ref, adj_ref, out_ref, bias_ref,
                     *, alpha, f_out, row_tile):
    """One (row-tile, head) grid step of masked-softmax graph attention.

    grid = (row_tiles, heads); heads is the inner "arbitrary" axis, so the
    int8 adjacency row tile stays resident across heads and the additive mask
    bias is computed only once per row tile (h == 0).
    """
    @pl.when(pl.program_id(1) == 0)
    def _():
        bias_ref[...] = jnp.where(adj_ref[...] > 0, 0.0,
                                  -9e15).astype(jnp.bfloat16)

    a1 = a_ref[:, :f_out].astype(jnp.float32)               # (1, F_out)
    f2 = f2_ref[...]                                        # (1, N) f32

    # f1 for this row tile, recomputed from the resident bf16 Wh rows (drops
    # the lane-padded (N, 1) side input; costs only TN*F_out VPU flops).
    row0 = pl.multiple_of(pl.program_id(0) * row_tile, row_tile)
    wh_rows = wh_ref[pl.ds(row0, row_tile), :].astype(jnp.float32)
    f1 = jnp.sum(wh_rows * a1, axis=1, keepdims=True)       # (TN, 1)

    e = f1 + f2                                             # (TN, N)
    e = jnp.where(e > 0, e, alpha * e)                      # LeakyReLU
    e = e + bias_ref[...].astype(jnp.float32)               # mask non-edges

    m = jnp.max(e, axis=1, keepdims=True)
    # TODO(synk): on v6e/v7x the exp could run in packed bf16 for ~2x EUP
    # throughput; kept f32 for accuracy and v5e compatibility.
    p = jnp.exp(e - m)                                      # unnormalized softmax
    s = jnp.sum(p, axis=1, keepdims=True)

    # bf16 x bf16 MXU matmul with f32 accumulation; the softmax denominator is
    # folded into the O(TN*F_out) output scale via the EUP reciprocal.
    acc = jnp.dot(p.astype(jnp.bfloat16), wh_ref[...],
                  preferred_element_type=jnp.float32)       # (TN, F_out)
    out_ref[...] = acc * pl.reciprocal(s, approx=True)


# ---------------------------------------------------------------------------
# Tiling / padding plan
# ---------------------------------------------------------------------------

def _round_up(x, m):
    return ((x + m - 1) // m) * m


def _plan_row_tiling(n, row_tile, vmem_budget=32 * 1024 * 1024):
    """Pick (n_pad, tn): padded row count and a row-tile size (multiple of 32).

    Rows are padded (padded rows have no edges and are sliced off) instead of
    falling back to TN = N, so tiles stay big and clean for any N.  The tile
    shrinks until the attention working set fits the budget (v7x: 64 MiB/core).
    """
    tn = max(32, (min(row_tile, _round_up(n, 32)) // 32) * 32)

    def est(t):
        npad = _round_up(n, t)
        # adj double-buffer (int8) + bias scratch (bf16)
        # + ~3 (t, npad) f32 softmax temporaries, + ~2 MiB for the rest.
        return t * npad * (2 * 1 + 2 + 3 * 4) + (2 << 20)

    while tn > 64 and est(tn) > vmem_budget:
        tn = max(64, ((tn // 2) // 32) * 32)
    return _round_up(n, tn), tn


# ---------------------------------------------------------------------------
# One multi-head dense GraphAttentionLayer (all heads, eval mode, no ELU)
# ---------------------------------------------------------------------------

def gat_multihead_layer(x_pad, w_stack, a_stack, adj_i8, *, alpha, tn,
                        adj_buffers=2):
    """All heads of one dense GraphAttentionLayer forward on padded inputs.

    x_pad: (N_pad, F_in) f32, adj_i8: (N_pad, N_pad) int8, w_stack: (H, F_in,
    F_out), a_stack: (H, 1, 2*F_out).  Returns (N_pad, H*F_out) f32 (head
    blocks concatenated along dim 1, matching torch.cat(..., dim=1)).
    """
    n_pad, f_in = x_pad.shape
    n_heads, _, f_out = w_stack.shape
    wh_cols = n_heads * f_out
    grid_rows = n_pad // tn

    # Augmented, head-fused weight: [W_0 | ... | W_{H-1} | W_h @ a2_h].
    w_all = jnp.transpose(w_stack, (1, 0, 2)).reshape(f_in, wh_cols)
    a2 = a_stack[:, 0, f_out:]                               # (H, F_out)
    wa2 = jnp.einsum("hif,hf->ih", w_stack, a2)              # (F_in, H)
    w_aug = jnp.concatenate([w_all, wa2], axis=1).astype(jnp.bfloat16)

    # --- head-fused projection kernel (one wide MXU matmul per row tile) ---
    wh_flat, f2c = pl.pallas_call(
        functools.partial(_gat_proj_kernel, wh_cols=wh_cols),
        grid=(grid_rows,),
        in_specs=[
            pl.BlockSpec((tn, f_in), lambda i: (i, 0)),
            pl.BlockSpec((f_in, wh_cols + n_heads), lambda i: (0, 0)),
        ],
        out_specs=(
            pl.BlockSpec((tn, wh_cols), lambda i: (i, 0)),
            pl.BlockSpec((tn, n_heads), lambda i: (i, 0)),
        ),
        out_shape=(
            jax.ShapeDtypeStruct((n_pad, wh_cols), jnp.bfloat16),
            jax.ShapeDtypeStruct((n_pad, n_heads), jnp.float32),
        ),
        compiler_params=pltpu.CompilerParams(
            dimension_semantics=("parallel",)),
    )(x_pad, w_aug)

    # Tiny head-major relayouts: Wh -> (H, N, F_out) bf16, f2 -> (H, 1, N) f32.
    wh3 = jnp.transpose(wh_flat.reshape(n_pad, n_heads, f_out), (1, 0, 2))
    f2row = jnp.transpose(f2c, (1, 0)).reshape(n_heads, 1, n_pad)

    adj_spec = pl.BlockSpec((tn, n_pad), lambda i, h: (i, 0))
    if adj_buffers != 2:
        # v5e (H=1 output layer) is adj-stream-bound: deeper buffering (e.g. 3)
        # hides DMA latency there; not worth the VMEM on v6e/v7x.
        adj_spec = pl.BlockSpec((tn, n_pad), lambda i, h: (i, 0),
                                pipeline_mode=pl.Buffered(adj_buffers))

    flops = n_heads * (2 * n_pad * n_pad * f_out + 8 * n_pad * n_pad)
    bytes_accessed = (n_pad * n_pad                                  # adj int8
                      + grid_rows * n_heads * n_pad * f_out * 2      # Wh re-reads
                      + n_heads * n_pad * (f_out * 4 + 4))           # out + f2

    # --- row-tiled, head-inner attention kernel ---
    out3 = pl.pallas_call(
        functools.partial(_gat_attn_kernel, alpha=alpha, f_out=f_out,
                          row_tile=tn),
        grid=(grid_rows, n_heads),
        in_specs=[
            pl.BlockSpec((None, n_pad, f_out), lambda i, h: (h, 0, 0)),  # Wh (head h)
            pl.BlockSpec((None, 1, n_pad), lambda i, h: (h, 0, 0)),      # f2 row
            pl.BlockSpec((None, 1, 2 * f_out), lambda i, h: (h, 0, 0)),  # a (for f1)
            adj_spec,                                                    # int8 adj tile
        ],
        out_specs=pl.BlockSpec((None, tn, f_out), lambda i, h: (h, i, 0)),
        out_shape=jax.ShapeDtypeStruct((n_heads, n_pad, f_out), jnp.float32),
        scratch_shapes=[pltpu.VMEM((tn, n_pad), jnp.bfloat16)],          # mask bias
        compiler_params=pltpu.CompilerParams(
            dimension_semantics=("parallel", "arbitrary"),   # rows megacore-shard
            vmem_limit_bytes=40 * 1024 * 1024),              # fits v7x 64 MiB/core
        cost_estimate=pl.CostEstimate(
            flops=int(flops),
            transcendentals=int(n_heads * n_pad * n_pad),
            bytes_accessed=int(bytes_accessed)),
    )(wh3, f2row, a_stack, adj_i8)

    # (H, N, F_out) -> (N, H*F_out), matching torch.cat([...], dim=1).
    return jnp.transpose(out3, (1, 0, 2)).reshape(n_pad, wh_cols)


# ---------------------------------------------------------------------------
# Parameters + full forward
# ---------------------------------------------------------------------------

def init_gat_params(key, nfeat, nhid, nclass, nheads):
    """Xavier-uniform-ish init matching pyGAT param shapes (stacked per head)."""
    gain = 1.414
    keys = jax.random.split(key, 2 * nheads + 2)
    lim_w = gain * (6.0 / (nfeat + nhid)) ** 0.5
    lim_a = gain * (6.0 / (2 * nhid + 1)) ** 0.5
    w1 = jnp.stack([
        jax.random.uniform(keys[2 * h], (nfeat, nhid), jnp.float32, -lim_w, lim_w)
        for h in range(nheads)])                               # (H, nfeat, nhid)
    a1 = jnp.stack([
        jax.random.uniform(keys[2 * h + 1], (2 * nhid, 1), jnp.float32,
                           -lim_a, lim_a).reshape(1, 2 * nhid)
        for h in range(nheads)])                               # (H, 1, 2*nhid)
    lim_wo = gain * (6.0 / (nhid * nheads + nclass)) ** 0.5
    lim_ao = gain * (6.0 / (2 * nclass + 1)) ** 0.5
    w_out = jax.random.uniform(keys[-2], (1, nhid * nheads, nclass),
                               jnp.float32, -lim_wo, lim_wo)   # (1, H*nhid, nclass)
    a_out = jax.random.uniform(keys[-1], (1, 1, 2 * nclass),
                               jnp.float32, -lim_ao, lim_ao)   # (1, 1, 2*nclass)
    return {"w1": w1, "a1": a1, "w_out": w_out, "a_out": a_out}


def _elu(x):
    return jnp.where(x > 0, x, jnp.expm1(jnp.minimum(x, 0.0)))   # exact F.elu


def gat_forward(params, x, adj, *, alpha, row_tile=512, adj_buffers=2):
    """GAT forward, mode='observation', mini_batch=False (eval mode)."""
    n = x.shape[0]
    n_pad, tn = _plan_row_tiling(n, row_tile)

    # Pad rows so every tile is full; padded rows have no edges (adj = 0), so
    # they never influence real rows and are sliced away at the end.
    # int8 adjacency: 4x less HBM traffic than f32 for the dominant N^2 stream.
    x_pad = jnp.pad(x, ((0, n_pad - n), (0, 0)))
    adj_i8 = jnp.pad((adj > 0).astype(jnp.int8),
                     ((0, n_pad - n), (0, n_pad - n)))

    # multi-head layer 1 (per-head ELU is elementwise -> applied after concat)
    h = gat_multihead_layer(x_pad, params["w1"], params["a1"], adj_i8,
                            alpha=alpha, tn=tn, adj_buffers=adj_buffers)
    h = _elu(h)
    # output attention layer (single head, concat=False) followed by F.elu
    out = gat_multihead_layer(h, params["w_out"], params["a_out"], adj_i8,
                              alpha=alpha, tn=tn, adj_buffers=adj_buffers)
    # NOTE: rows with no edges get a uniform softmax (matches pyGAT); the spec
    # forward for mode='observation' ends with F.elu (no log_softmax).
    return _elu(out)[:n]


if __name__ == "__main__":
    # small-but-tiled shapes: N=128 nodes, nfeat=8, nhid=8, nclass=4, nheads=2
    N, NFEAT, NHID, NCLASS, NHEADS = 128, 8, 8, 4, 2
    ALPHA = 0.2          # LeakyReLU negative slope
    DROPOUT = 0.6        # unused at inference

    key = jax.random.PRNGKey(0)
    kx, kadj, kparams = jax.random.split(key, 3)

    x = jax.random.normal(kx, (N, NFEAT), jnp.float32)
    # dense adjacency with self-loops
    adj = (jax.random.uniform(kadj, (N, N)) > 0.7).astype(jnp.float32)
    adj = jnp.maximum(adj, jnp.eye(N, dtype=jnp.float32))

    params = init_gat_params(kparams, NFEAT, NHID, NCLASS, NHEADS)

    # row_tile=64 -> 2 row tiles x H heads per layer, exercising the tiled,
    # head-inner, adjacency-resident grid path.
    out = gat_forward(params, x, adj, alpha=ALPHA, row_tile=64)
    out = jax.block_until_ready(out)
    assert out.shape == (N, NCLASS)
    assert bool(jnp.all(jnp.isfinite(out)))
    print("KERNEL_OK")
</pallas_src>

<mosaic_0001>
module attributes {stable_mosaic.version = 11 : i64} {
  func.func @_gat_proj_kernel(%arg0: i32, %arg1: memref<64x8xf32, #tpu.memory_space<vmem>>, %arg2: memref<8x18xbf16, #tpu.memory_space<vmem>>, %arg3: memref<64x16xbf16, #tpu.memory_space<vmem>>, %arg4: memref<64x2xf32, #tpu.memory_space<vmem>>) attributes {dimension_semantics = [#tpu.dimension_semantics<parallel>], iteration_bounds = array<i64: 2>, scalar_prefetch = 0 : i64, scratch_operands = 0 : i64, tpu.core_type = #tpu.core_type<tc>, window_params = [{transform_indices = @transform_0, window_bounds = array<i64: 64, 8>}, {pipeline_mode = #tpu.pipeline_mode<synchronous>, transform_indices = @transform_1, window_bounds = array<i64: 8, 18>}, {transform_indices = @transform_2, window_bounds = array<i64: 64, 16>}, {transform_indices = @transform_3, window_bounds = array<i64: 64, 2>}]} {
    %c0 = arith.constant 0 : index
    %c0_0 = arith.constant 0 : index
    %0 = vector.load %arg1[%c0, %c0_0] : memref<64x8xf32, #tpu.memory_space<vmem>>, vector<64x8xf32>
    %1 = arith.truncf %0 : vector<64x8xf32> to vector<64x8xbf16>
    %c0_1 = arith.constant 0 : index
    %c0_2 = arith.constant 0 : index
    %2 = vector.load %arg2[%c0_1, %c0_2] : memref<8x18xbf16, #tpu.memory_space<vmem>>, vector<8x18xbf16>
    %cst = arith.constant dense<0.000000e+00> : vector<64x18xf32>
    %3 = tpu.matmul %1, %2, %cst {dimension_numbers = #tpu.dot_dimension_numbers<[1], [0], [0], [1], [0, 0, 1, 1], [], []>} : vector<64x8xbf16>, vector<8x18xbf16>, vector<64x18xf32> -> vector<64x18xf32>
    %4 = vector.extract_strided_slice %3 {offsets = [0, 0], sizes = [64, 16], strides = [1, 1]} : vector<64x18xf32> to vector<64x16xf32>
    %5 = arith.truncf %4 : vector<64x16xf32> to vector<64x16xbf16>
    %c0_3 = arith.constant 0 : index
    %c0_4 = arith.constant 0 : index
    %6 = vector.load %arg3[%c0_3, %c0_4] : memref<64x16xbf16, #tpu.memory_space<vmem>>, vector<64x16xbf16>
    tpu.vector_store %arg3[%c0_3, %c0_4], %5 {strides = array<i32>} : memref<64x16xbf16, #tpu.memory_space<vmem>>, vector<64x16xbf16>,
    %7 = vector.extract_strided_slice %3 {offsets = [0, 16], sizes = [64, 2], strides = [1, 1]} : vector<64x18xf32> to vector<64x2xf32>
    %c0_5 = arith.constant 0 : index
    %c0_6 = arith.constant 0 : index
    %8 = vector.load %arg4[%c0_5, %c0_6] : memref<64x2xf32, #tpu.memory_space<vmem>>, vector<64x2xf32>
    tpu.vector_store %arg4[%c0_5, %c0_6], %7 {strides = array<i32>} : memref<64x2xf32, #tpu.memory_space<vmem>>, vector<64x2xf32>,
    return
  }
  func.func @transform_0(%arg0: i32) -> (i32, i32) {
    %c0_i32 = arith.constant 0 : i32
    %c0_i32_0 = arith.constant 0 : i32
    return %arg0, %c0_i32 : i32, i32
  }
  func.func @transform_1(%arg0: i32) -> (i32, i32) {
    %c0_i32 = arith.constant 0 : i32
    %c0_i32_0 = arith.constant 0 : i32
    %c0_i32_1 = arith.constant 0 : i32
    return %c0_i32, %c0_i32_0 : i32, i32
  }
  func.func @transform_2(%arg0: i32) -> (i32, i32) {
    %c0_i32 = arith.constant 0 : i32
    %c0_i32_0 = arith.constant 0 : i32
    return %arg0, %c0_i32 : i32, i32
  }
  func.func @transform_3(%arg0: i32) -> (i32, i32) {
    %c0_i32 = arith.constant 0 : i32
    %c0_i32_0 = arith.constant 0 : i32
    return %arg0, %c0_i32 : i32, i32
  }
}

</mosaic_0001>

<bundles_post_ra>
// kernel: tpu_custom_call.1
= control target key start
LH: loop header
LB: loop body
LE: loop exit
PB: predicated region body
PF: predicated region fallthrough
CT: control target
= control target key end

     0   :  { %s546_s12 = smov 0   ;;  %s603_s0 = inlined_call_operand.vmem [shape: f32[128,8], index: 0, kind: input, shape index: {}]   ;;  %s604_s1 = inlined_call_operand.vmem [shape: bf16[8,18], index: 1, kind: input, shape index: {}]   ;;  %s605_s2 = inlined_call_operand.vmem [shape: bf16[128,16], index: 2, kind: output, shape index: {0}]   ;;  %s606_s3 = inlined_call_operand.vmem [shape: f32[128,2], index: 3, kind: output, shape index: {1}]  }
   0x1 LB: > { %s456_s13 = sadd.s32 4294967295, %s523_s12   ;;  %p460_p0 = scmp.ge.s32.totalorder %s523_s12, 1  ;;  %s523_s12 = sphi %s546_s12, %s14_s12  }
   0x2   : > { %p141_p1 = scmp.lt.s32.totalorder %s523_s12, 3 }
   0x4   : > { %p142_p2 = pnand %p460_p0, %p141_p1 }
   0x5   : > { %v201_v0 = vld [vmem:[%s604_s1] sm:$0xf] (!%p142_p2)  ;;  %vm215_vm0 = vcmask (!%p142_p2), 1043456   ;;  %s461_s16 = sshll.u32 (!%p142_p2), %s456_s13, 3  ;;  %vm202_vm1 = vcmask (!%p142_p2), 64512   ;;  %vm316_vm2 = vcmask (!%p142_p2), 125952  }
   0x6   : > { %145 = sbr.rel (%p142_p2) target bundleno = 361 (0x169), region = 28  ;;  %506 = vmatprep.subr.msk.bf16.mxu0 (!%p142_p2), %vm215_vm0, %v201_v0  ;;  %507 = vmatprep.subr.msk.bf16.mxu1 (!%p142_p2), %vm215_vm0, %v201_v0  ;;  %v217_v1 = vsel (!%p142_p2), %vm215_vm0, %v201_v0, 0  ;;  %p171_p3 = scmp.lt.s32.totalorder (!%p142_p2), %s461_s16, 15  ;;  %vm357_vm3 = vcmask (!%p142_p2), 15360  }
   0x7   : > { %495 = vmatpush3.bf16.msra.mxu0 (!%p142_p2), %v217_v1  ;;  %505 = vmatpush3.bf16.msra.mxu1 (!%p142_p2), %v217_v1  ;;  %s525_s25 = smov (!%p142_p2), 112  }
   0xd   : > { %s608_s16 = smov (!%p171_p3, %s461_s16), 15 }
   0xe   : > { %s462_s17 = sshll.u32 %s608_s16, 3  ;;  %s464_s21 = sshll.u32 %s608_s16, 2 }
   0xf   : > { %s174_s20 = scalar_lea.vmem %s603_s0, %s462_s17  ;;  %s569_s24 = scalar_lea.vmem %s605_s2, %s464_s21 }
  0x10   : > { %v189_v2 = vld [vmem:[%s174_s20] sm:$0xff]  ;;  %v190_v3 = vld [vmem:[%s174_s20 + $0x8] sm:$0xff]  ;;  %v191_v4 = vld [vmem:[%s174_s20 + $0x10] sm:$0xff]  ;;  %s186_s28 = scalar_lea.vmem %s606_s3, %s462_s17 }
  0x11   : > { %v197_v5 = vpack.c.bf16 %v190_v3, %v189_v2  ;;  %v192_v6 = vld [vmem:[%s174_s20 + $0x18] sm:$0xff]  ;;  %v193_v7 = vld [vmem:[%s174_s20 + $0x20] sm:$0xff]  ;;  %v194_v8 = vld [vmem:[%s174_s20 + $0x28] sm:$0xff] }
  0x12   : > { %v198_v9 = vpack.c.bf16 %v192_v6, %v191_v4  ;;  %v199_v10 = vpack.c.bf16 %v194_v8, %v193_v7  ;;  %v195_v11 = vld [vmem:[%s174_s20 + $0x30] sm:$0xff]  ;;  %v196_v12 = vld [vmem:[%s174_s20 + $0x38] sm:$0xff] }
  0x13   : > { %496 = vmatprep.mubr.msk.bf16.mxu0 %vm202_vm1, %v197_v5  ;;  %v200_v13 = vpack.c.bf16 %v196_v12, %v195_v11 }
  0x14   : > { %497 = vmatmul.mubr.msk.bf16.vlgmr.msra.gmra.mrb[0].mxu0 %vm202_vm1, %v198_v9  ;;  %500 = vmatprep.mubr.msk.bf16.mxu1 %vm202_vm1, %v199_v10 }
  0x15   : > { %501 = vmatmul.mubr.msk.bf16.vlgmr.msra.gmra.mrb[0].mxu1 %vm202_vm1, %v200_v13 }
  0xe7   : > { %v498_v14 = vpop.f32.mrb[0].mxu0 }
  0xe8   : > { %v483_v15 = vpack.c.bf16 %v498_v14, %v498_v14  ;;  %v502_v16 = vpop.f32.mrb[0].mxu1  ;;  %337 = vrot.lane.b32.xlu1 %v498_v14, %s525_s25  ;;  %v253_v17 = vpop.f32.mrb[1].mxu0 }
  0xe9   : > { %v487_v18 = vpack.c.bf16 %v502_v16, %v502_v16  ;;  %v481_v19 = vpack.c.bf16 %v253_v17, %v253_v17  ;;  %v269_v20 = vpop.f32.mrb[1].mxu1  ;;  %333 = vrot.lane.b32.xlu0 %v253_v17, %s525_s25  ;;  %v499_v21 = vpop.f32.mrb[2].mxu0 }
  0xea   : > { %319 = vst.msk [vmem:[%s569_s24 + $0x8] sm:$0xf] %vm316_vm2, %v483_v15  ;;  %v485_v22 = vpack.c.bf16 %v269_v20, %v269_v20  ;;  %v484_v23 = vpack.c.bf16 %v499_v21, %v499_v21  ;;  %v256_v24 = vpop.f32.mrb[3].mxu0  ;;  %v503_v25 = vpop.f32.mrb[2].mxu1 }
  0xeb   : > { %323 = vst.msk [vmem:[%s569_s24 + $0x18] sm:$0xf] %vm316_vm2, %v487_v18  ;;  %317 = vst.msk [vmem:[%s569_s24] sm:$0xf] %vm316_vm2, %v481_v19  ;;  %v482_v26 = vpack.c.bf16 %v256_v24, %v256_v24  ;;  %v488_v27 = vpack.c.bf16 %v503_v25, %v503_v25  ;;  %v272_v28 = vpop.f32.mrb[3].mxu1 }
  0xec   : > { %321 = vst.msk [vmem:[%s569_s24 + $0x10] sm:$0xf] %vm316_vm2, %v485_v22  ;;  %320 = vst.msk [vmem:[%s569_s24 + $0xc] sm:$0xf] %vm316_vm2, %v484_v23  ;;  %v486_v29 = vpack.c.bf16 %v272_v28, %v272_v28  ;;  %339 = vrot.lane.b32.xlu1 %v499_v21, %s525_s25 }
  0xed   : > { %318 = vst.msk [vmem:[%s569_s24 + $0x4] sm:$0xf] %vm316_vm2, %v482_v26  ;;  %324 = vst.msk [vmem:[%s569_s24 + $0x1c] sm:$0xf] %vm316_vm2, %v488_v27  ;;  %341 = vrot.lane.b32.xlu0 %v269_v20, %s525_s25 }
  0xee   : > { %322 = vst.msk [vmem:[%s569_s24 + $0x14] sm:$0xf] %vm316_vm2, %v486_v29 }
  0xf0   : > { %343 = vrot.lane.b32.xlu1 %v272_v28, %s525_s25 }
  0xf1   : > { %335 = vrot.lane.b32.xlu0 %v256_v24, %s525_s25 }
  0xf4   : > { %347 = vrot.lane.b32.xlu1 %v503_v25, %s525_s25 }
  0xf5   : > { %345 = vrot.lane.b32.xlu0 %v502_v16, %s525_s25 }
 0x15a   : > { %v338_v30 = vpop.permute.xlu1 %337 }
 0x15b   : > { %360 = vst.msk [vmem:[%s186_s28 + $0x10] sm:$0xff] %vm357_vm3, %v338_v30  ;;  %v334_v31 = vpop.permute.xlu0 %333 }
 0x15c   : > { %358 = vst.msk [vmem:[%s186_s28] sm:$0xff] %vm357_vm3, %v334_v31 }
 0x15e   : > { %v340_v32 = vpop.permute.xlu1 %339 }
 0x15f   : > { %361 = vst.msk [vmem:[%s186_s28 + $0x18] sm:$0xff] %vm357_vm3, %v340_v32  ;;  %v342_v33 = vpop.permute.xlu0 %341 }
 0x160   : > { %362 = vst.msk [vmem:[%s186_s28 + $0x20] sm:$0xff] %vm357_vm3, %v342_v33 }
 0x162   : > { %v344_v34 = vpop.permute.xlu1 %343 }
 0x163   : > { %363 = vst.msk [vmem:[%s186_s28 + $0x28] sm:$0xff] %vm357_vm3, %v344_v34  ;;  %v336_v35 = vpop.permute.xlu0 %335 }
 0x164   : > { %359 = vst.msk [vmem:[%s186_s28 + $0x8] sm:$0xff] %vm357_vm3, %v336_v35 }
 0x166   : > { %v348_v36 = vpop.permute.xlu1 %347 }
 0x167   : > { %365 = vst.msk [vmem:[%s186_s28 + $0x38] sm:$0xff] %vm357_vm3, %v348_v36  ;;  %v346_v37 = vpop.permute.xlu0 %345 }
 0x168   : > { %364 = vst.msk [vmem:[%s186_s28 + $0x30] sm:$0xff] %vm357_vm3, %v346_v37 }
 0x169 PF: > { %s14_s12 = sadd.s32 1, %s523_s12  }
 0x16a   : > { %p11_p4 = scmp.ge.s32.totalorder %s14_s12, 4  }
 0x16c   :  { %13 = sbr.rel (!%p11_p4) target bundleno = 1 (0x1), region = 70 }

</bundles_post_ra>
